<compile_context>
chip_gen: v7x
topology: tpu7x:2x2x1
jax: 0.10.0
libtpu: 0.0.40
codegen_flags: <defaults>
</compile_context>

<pallas_src>
import functools

import jax
import jax.numpy as jnp
from jax import lax
from jax.experimental import pallas as pl
from jax.experimental.pallas import tpu as pltpu

NEG_SLOPE = 0.01  # PyTorch nn.LeakyReLU default negative_slope


def _leaky(y):
    return jnp.where(y > 0, y, NEG_SLOPE * y)


# ---------------------------------------------------------------------------
# Fused kernel: whole residual block for one batch element per grid step.
# ---------------------------------------------------------------------------
def _fused_block_kernel(x_ref, w1_ref, b1_ref, w2_ref, b2_ref, wx_ref, bx_ref,
                        res_ref, down_ref, *, H, W, C):
    Lc = W * C
    x2d = x_ref[...]                                     # (H, W*Cin), lane dense

    def conv3x3(inp, w_ref, b_ref):
        # "same" 3x3 conv as 3 banded matmuls (one per vertical tap ky).
        # Horizontal zero padding lives inside the banded weights; vertical
        # zero padding = sublane roll + row mask (off the MXU path).
        n = inp.shape[0]
        rows = lax.broadcasted_iota(jnp.int32, inp.shape, 0)
        up = jnp.where(rows > 0, pltpu.roll(inp, shift=1, axis=0), 0.0)          # inp[h-1]
        dn = jnp.where(rows < n - 1, pltpu.roll(inp, shift=n - 1, axis=0), 0.0)  # inp[h+1]
        acc = jnp.dot(up, w_ref[0], preferred_element_type=jnp.float32)
        acc = acc + jnp.dot(inp, w_ref[1], preferred_element_type=jnp.float32)
        acc = acc + jnp.dot(dn, w_ref[2], preferred_element_type=jnp.float32)
        return acc + b_ref[...]

    h = _leaky(conv3x3(x2d, w1_ref, b1_ref))             # (H, W*C)
    h = _leaky(conv3x3(h, w2_ref, b2_ref))               # (H, W*C)
    sc = jnp.dot(x2d, wx_ref[...],
                 preferred_element_type=jnp.float32) + bx_ref[...]
    r = jnp.maximum(h + sc, 0.0)                         # residual + ReLU
    res_ref[...] = r                                     # unmasked 128-lane store

    # 2x2 / stride-2 max pool on the register-resident residual.
    rr = r.reshape(H // 2, 2, Lc)
    vm = jnp.maximum(rr[:, 0, :], rr[:, 1, :])           # vertical pair max (Ho, W*C)
    pm = jnp.maximum(vm, pltpu.roll(vm, shift=Lc - C, axis=1))  # horizontal pair max
    down_ref[...] = pm   # valid at even-w lane blocks; wrapper compacts (layout plumbing)


# ---------------------------------------------------------------------------
# Host-side weight transforms (tiny, done once per call in plain JAX)
# ---------------------------------------------------------------------------
def _conv3x3_banded_weights(w_oihw, W):
    """(Cout, Cin, 3, 3) OIHW -> (3, W*Cin, W*Cout) banded matmul matrices."""
    Cout, Cin, KH, KW = w_oihw.shape
    wt = jnp.transpose(w_oihw, (2, 3, 1, 0)).astype(jnp.float32)  # (ky, kx, Cin, Cout)
    bands = []
    for ky in range(KH):
        band = jnp.zeros((W * Cin, W * Cout), jnp.float32)
        for kx in range(KW):
            # input col w_in = w_out + kx - 1  ->  diagonal offset 1 - kx
            band = band + jnp.kron(jnp.eye(W, k=1 - kx, dtype=jnp.float32), wt[ky, kx])
        bands.append(band)
    return jnp.stack(bands, axis=0)


def _conv1x1_banded_weights(wx_mat, W):
    """(Cin, Cout) -> block-diagonal (W*Cin, W*Cout)."""
    return jnp.kron(jnp.eye(W, dtype=jnp.float32), wx_mat.astype(jnp.float32))


def _tile_bias(b, W):
    return jnp.tile(b.astype(jnp.float32), W)[None, :]   # (1, W*Cout)


# ---------------------------------------------------------------------------
# Wrapper
# ---------------------------------------------------------------------------
def encode_res_block_2d(x, params):
    """EncodeResBlock2D forward. x: (N, H, W, Cin) float32, NHWC.

    Returns (res, down): res (N, H, W, Cout), down (N, H//2, W//2, Cout).
    """
    N, H, W, Cin = x.shape
    C = params["w1"].shape[0]
    # TODO(synk): ceil_mode=True max-pool for odd H/W would need -inf edge padding.
    assert H % 2 == 0 and W % 2 == 0, "even spatial dims assumed (ceil==floor pool)"
    Ho, Wo = H // 2, W // 2
    Lc = W * C

    w1b = _conv3x3_banded_weights(params["w1"], W)       # (3, W*Cin, W*C)
    b1r = _tile_bias(params["b1"], W)                    # (1, W*C)
    w2b = _conv3x3_banded_weights(params["w2"], W)       # (3, W*C, W*C)
    b2r = _tile_bias(params["b2"], W)
    if params.get("wx") is not None:                     # in_chl != out_chl shortcut conv
        wx_mat = params["wx"][:, :, 0, 0].T              # (Cin, C)
        bx = params["bx"]
    else:
        assert Cin == C, "shortcut without conv_x requires in_chl == out_chl"
        wx_mat = jnp.eye(Cin, dtype=jnp.float32)         # identity shortcut
        bx = jnp.zeros((C,), jnp.float32)
    wxb = _conv1x1_banded_weights(wx_mat, W)             # (W*Cin, W*C)
    bxr = _tile_bias(bx, W)

    x2d = x.astype(jnp.float32).reshape(N, H, W * Cin)   # lane-dense input slab

    kern = functools.partial(_fused_block_kernel, H=H, W=W, C=C)
    res2d, down_raw = pl.pallas_call(
        kern,
        out_shape=(jax.ShapeDtypeStruct((N, H, Lc), jnp.float32),
                   jax.ShapeDtypeStruct((N, Ho, Lc), jnp.float32)),
        grid=(N,),
        in_specs=[
            pl.BlockSpec((None, H, W * Cin), lambda n: (n, 0, 0)),
            pl.BlockSpec((3, W * Cin, Lc), lambda n: (0, 0, 0)),
            pl.BlockSpec((1, Lc), lambda n: (0, 0)),
            pl.BlockSpec((3, Lc, Lc), lambda n: (0, 0, 0)),
            pl.BlockSpec((1, Lc), lambda n: (0, 0)),
            pl.BlockSpec((W * Cin, Lc), lambda n: (0, 0)),
            pl.BlockSpec((1, Lc), lambda n: (0, 0)),
        ],
        out_specs=(pl.BlockSpec((None, H, Lc), lambda n: (n, 0, 0)),
                   pl.BlockSpec((None, Ho, Lc), lambda n: (n, 0, 0))),
        compiler_params=pltpu.CompilerParams(dimension_semantics=("parallel",)),
    )(x2d, w1b, b1r, w2b, b2r, wxb, bxr)

    res = res2d.reshape(N, H, W, C)                      # free contiguous reshape
    down = down_raw.reshape(N, Ho, Wo, 2, C)[:, :, :, 0, :]  # keep even-w blocks
    return res, down


# ---------------------------------------------------------------------------
# Pure-JAX reference (correctness check only)
# ---------------------------------------------------------------------------
def _ref_conv(x, w_oihw, b, pad):
    y = lax.conv_general_dilated(
        x, jnp.transpose(w_oihw, (2, 3, 1, 0)),
        window_strides=(1, 1), padding=[(pad, pad), (pad, pad)],
        dimension_numbers=("NHWC", "HWIO", "NHWC"))
    return y + b


def reference(x, params):
    h = _leaky(_ref_conv(x, params["w1"], params["b1"], 1))
    h = _leaky(_ref_conv(h, params["w2"], params["b2"], 1))
    sc = _ref_conv(x, params["wx"], params["bx"], 0) if params.get("wx") is not None else x
    res = jnp.maximum(h + sc, 0.0)
    down = lax.reduce_window(res, -jnp.inf, lax.max,
                             (1, 2, 2, 1), (1, 2, 2, 1), "VALID")
    return res, down


# ---------------------------------------------------------------------------
if __name__ == "__main__":
    N, H, W = 2, 16, 16
    in_chl, out_chl = 4, 8

    key = jax.random.PRNGKey(0)
    ks = jax.random.split(key, 7)
    params = {
        "w1": 0.2 * jax.random.normal(ks[0], (out_chl, in_chl, 3, 3), jnp.float32),
        "b1": 0.1 * jax.random.normal(ks[1], (out_chl,), jnp.float32),
        "w2": 0.2 * jax.random.normal(ks[2], (out_chl, out_chl, 3, 3), jnp.float32),
        "b2": 0.1 * jax.random.normal(ks[3], (out_chl,), jnp.float32),
        "wx": 0.2 * jax.random.normal(ks[4], (out_chl, in_chl, 1, 1), jnp.float32),
        "bx": 0.1 * jax.random.normal(ks[5], (out_chl,), jnp.float32),
    }
    x = jax.random.normal(ks[6], (N, H, W, in_chl), jnp.float32)

    res_out, down_out = encode_res_block_2d(x, params)
    jax.block_until_ready((res_out, down_out))

    res_ref, down_ref = reference(x, params)
    assert res_out.shape == (N, H, W, out_chl)
    assert down_out.shape == (N, H // 2, W // 2, out_chl)
    # Tolerance accommodates default-precision (bf16-operand) MXU matmuls vs the
    # XLA conv reference; an actual indexing/weight bug would show O(1) errors.
    assert jnp.allclose(res_out, res_ref, atol=5e-2, rtol=5e-2)
    assert jnp.allclose(down_out, down_ref, atol=5e-2, rtol=5e-2)
    print("KERNEL_OK")
</pallas_src>

<mosaic_0001>
module attributes {stable_mosaic.version = 11 : i64} {
  func.func @_fused_block_kernel(%arg0: i32, %arg1: memref<1x16x64xf32, #tpu.memory_space<vmem>>, %arg2: memref<3x64x128xf32, #tpu.memory_space<vmem>>, %arg3: memref<1x128xf32, #tpu.memory_space<vmem>>, %arg4: memref<3x128x128xf32, #tpu.memory_space<vmem>>, %arg5: memref<1x128xf32, #tpu.memory_space<vmem>>, %arg6: memref<64x128xf32, #tpu.memory_space<vmem>>, %arg7: memref<1x128xf32, #tpu.memory_space<vmem>>, %arg8: memref<1x16x128xf32, #tpu.memory_space<vmem>>, %arg9: memref<1x8x128xf32, #tpu.memory_space<vmem>>) attributes {dimension_semantics = [#tpu.dimension_semantics<parallel>], iteration_bounds = array<i64: 2>, scalar_prefetch = 0 : i64, scratch_operands = 0 : i64, tpu.core_type = #tpu.core_type<tc>, window_params = [{transform_indices = @transform_0, window_bounds = array<i64: 1, 16, 64>}, {pipeline_mode = #tpu.pipeline_mode<synchronous>, transform_indices = @transform_1, window_bounds = array<i64: 3, 64, 128>}, {pipeline_mode = #tpu.pipeline_mode<synchronous>, transform_indices = @transform_2, window_bounds = array<i64: 1, 128>}, {pipeline_mode = #tpu.pipeline_mode<synchronous>, transform_indices = @transform_3, window_bounds = array<i64: 3, 128, 128>}, {pipeline_mode = #tpu.pipeline_mode<synchronous>, transform_indices = @transform_4, window_bounds = array<i64: 1, 128>}, {pipeline_mode = #tpu.pipeline_mode<synchronous>, transform_indices = @transform_5, window_bounds = array<i64: 64, 128>}, {pipeline_mode = #tpu.pipeline_mode<synchronous>, transform_indices = @transform_6, window_bounds = array<i64: 1, 128>}, {transform_indices = @transform_7, window_bounds = array<i64: 1, 16, 128>}, {transform_indices = @transform_8, window_bounds = array<i64: 1, 8, 128>}]} {
    %c0 = arith.constant 0 : index
    %c0_0 = arith.constant 0 : index
    %c0_1 = arith.constant 0 : index
    %0 = vector.load %arg1[%c0, %c0_0, %c0_1] : memref<1x16x64xf32, #tpu.memory_space<vmem>>, vector<1x16x64xf32>
    %1 = vector.shape_cast %0 : vector<1x16x64xf32> to vector<16x64xf32>
    %2 = tpu.iota {dimensions = array<i32: 0>} : vector<16x64xi32>
    %c0_i32 = arith.constant 0 : i32
    %3 = vector.broadcast %c0_i32 : i32 to vector<16x64xi32>
    %4 = arith.cmpi sgt, %2, %3 : vector<16x64xi32>
    %c1_i32 = arith.constant 1 : i32
    %5 = tpu.dynamic_rotate %1 by %c1_i32 dim 0 : vector<16x64xf32>, i32 -> vector<16x64xf32>
    %cst = arith.constant 0.000000e+00 : f32
    %6 = vector.broadcast %cst : f32 to vector<16x64xf32>
    %7 = arith.select %4, %5, %6 : vector<16x64xi1>, vector<16x64xf32>
    %c15_i32 = arith.constant 15 : i32
    %8 = vector.broadcast %c15_i32 : i32 to vector<16x64xi32>
    %9 = arith.cmpi slt, %2, %8 : vector<16x64xi32>
    %c15_i32_2 = arith.constant 15 : i32
    %10 = tpu.dynamic_rotate %1 by %c15_i32_2 dim 0 : vector<16x64xf32>, i32 -> vector<16x64xf32>
    %cst_3 = arith.constant 0.000000e+00 : f32
    %11 = vector.broadcast %cst_3 : f32 to vector<16x64xf32>
    %12 = arith.select %9, %10, %11 : vector<16x64xi1>, vector<16x64xf32>
    %c0_4 = arith.constant 0 : index
    %c0_5 = arith.constant 0 : index
    %c0_6 = arith.constant 0 : index
    %13 = vector.load %arg2[%c0_4, %c0_5, %c0_6] : memref<3x64x128xf32, #tpu.memory_space<vmem>>, vector<1x64x128xf32>
    %14 = vector.shape_cast %13 : vector<1x64x128xf32> to vector<64x128xf32>
    %cst_7 = arith.constant dense<0.000000e+00> : vector<16x128xf32>
    %15 = tpu.matmul %7, %14, %cst_7 {dimension_numbers = #tpu.dot_dimension_numbers<[1], [0], [0], [1], [0, 0, 1, 1], [], []>} : vector<16x64xf32>, vector<64x128xf32>, vector<16x128xf32> -> vector<16x128xf32>
    %c1 = arith.constant 1 : index
    %c0_8 = arith.constant 0 : index
    %c0_9 = arith.constant 0 : index
    %16 = vector.load %arg2[%c1, %c0_8, %c0_9] : memref<3x64x128xf32, #tpu.memory_space<vmem>>, vector<1x64x128xf32>
    %17 = vector.shape_cast %16 : vector<1x64x128xf32> to vector<64x128xf32>
    %cst_10 = arith.constant dense<0.000000e+00> : vector<16x128xf32>
    %18 = tpu.matmul %1, %17, %cst_10 {dimension_numbers = #tpu.dot_dimension_numbers<[1], [0], [0], [1], [0, 0, 1, 1], [], []>} : vector<16x64xf32>, vector<64x128xf32>, vector<16x128xf32> -> vector<16x128xf32>
    %19 = arith.addf %15, %18 : vector<16x128xf32>
    %c2 = arith.constant 2 : index
    %c0_11 = arith.constant 0 : index
    %c0_12 = arith.constant 0 : index
    %20 = vector.load %arg2[%c2, %c0_11, %c0_12] : memref<3x64x128xf32, #tpu.memory_space<vmem>>, vector<1x64x128xf32>
    %21 = vector.shape_cast %20 : vector<1x64x128xf32> to vector<64x128xf32>
    %cst_13 = arith.constant dense<0.000000e+00> : vector<16x128xf32>
    %22 = tpu.matmul %12, %21, %cst_13 {dimension_numbers = #tpu.dot_dimension_numbers<[1], [0], [0], [1], [0, 0, 1, 1], [], []>} : vector<16x64xf32>, vector<64x128xf32>, vector<16x128xf32> -> vector<16x128xf32>
    %23 = arith.addf %19, %22 : vector<16x128xf32>
    %c0_14 = arith.constant 0 : index
    %c0_15 = arith.constant 0 : index
    %24 = vector.load %arg3[%c0_14, %c0_15] : memref<1x128xf32, #tpu.memory_space<vmem>>, vector<1x128xf32>
    %25 = vector.broadcast %24 : vector<1x128xf32> to vector<16x128xf32>
    %26 = arith.addf %23, %25 : vector<16x128xf32>
    %cst_16 = arith.constant 0.000000e+00 : f32
    %27 = vector.broadcast %cst_16 : f32 to vector<16x128xf32>
    %28 = arith.cmpf ogt, %26, %27 : vector<16x128xf32>
    %cst_17 = arith.constant 0.00999999977 : f32
    %29 = vector.broadcast %cst_17 : f32 to vector<16x128xf32>
    %30 = arith.mulf %29, %26 : vector<16x128xf32>
    %31 = arith.select %28, %26, %30 : vector<16x128xi1>, vector<16x128xf32>
    %32 = tpu.iota {dimensions = array<i32: 0>} : vector<16x128xi32>
    %c0_i32_18 = arith.constant 0 : i32
    %33 = vector.broadcast %c0_i32_18 : i32 to vector<16x128xi32>
    %34 = arith.cmpi sgt, %32, %33 : vector<16x128xi32>
    %c1_i32_19 = arith.constant 1 : i32
    %35 = tpu.dynamic_rotate %31 by %c1_i32_19 dim 0 : vector<16x128xf32>, i32 -> vector<16x128xf32>
    %cst_20 = arith.constant 0.000000e+00 : f32
    %36 = vector.broadcast %cst_20 : f32 to vector<16x128xf32>
    %37 = arith.select %34, %35, %36 : vector<16x128xi1>, vector<16x128xf32>
    %c15_i32_21 = arith.constant 15 : i32
    %38 = vector.broadcast %c15_i32_21 : i32 to vector<16x128xi32>
    %39 = arith.cmpi slt, %32, %38 : vector<16x128xi32>
    %c15_i32_22 = arith.constant 15 : i32
    %40 = tpu.dynamic_rotate %31 by %c15_i32_22 dim 0 : vector<16x128xf32>, i32 -> vector<16x128xf32>
    %cst_23 = arith.constant 0.000000e+00 : f32
    %41 = vector.broadcast %cst_23 : f32 to vector<16x128xf32>
    %42 = arith.select %39, %40, %41 : vector<16x128xi1>, vector<16x128xf32>
    %c0_24 = arith.constant 0 : index
    %c0_25 = arith.constant 0 : index
    %c0_26 = arith.constant 0 : index
    %43 = vector.load %arg4[%c0_24, %c0_25, %c0_26] : memref<3x128x128xf32, #tpu.memory_space<vmem>>, vector<1x128x128xf32>
    %44 = vector.shape_cast %43 : vector<1x128x128xf32> to vector<128x128xf32>
    %cst_27 = arith.constant dense<0.000000e+00> : vector<16x128xf32>
    %45 = tpu.matmul %37, %44, %cst_27 {dimension_numbers = #tpu.dot_dimension_numbers<[1], [0], [0], [1], [0, 0, 1, 1], [], []>} : vector<16x128xf32>, vector<128x128xf32>, vector<16x128xf32> -> vector<16x128xf32>
    %c1_28 = arith.constant 1 : index
    %c0_29 = arith.constant 0 : index
    %c0_30 = arith.constant 0 : index
    %46 = vector.load %arg4[%c1_28, %c0_29, %c0_30] : memref<3x128x128xf32, #tpu.memory_space<vmem>>, vector<1x128x128xf32>
    %47 = vector.shape_cast %46 : vector<1x128x128xf32> to vector<128x128xf32>
    %cst_31 = arith.constant dense<0.000000e+00> : vector<16x128xf32>
    %48 = tpu.matmul %31, %47, %cst_31 {dimension_numbers = #tpu.dot_dimension_numbers<[1], [0], [0], [1], [0, 0, 1, 1], [], []>} : vector<16x128xf32>, vector<128x128xf32>, vector<16x128xf32> -> vector<16x128xf32>
    %49 = arith.addf %45, %48 : vector<16x128xf32>
    %c2_32 = arith.constant 2 : index
    %c0_33 = arith.constant 0 : index
    %c0_34 = arith.constant 0 : index
    %50 = vector.load %arg4[%c2_32, %c0_33, %c0_34] : memref<3x128x128xf32, #tpu.memory_space<vmem>>, vector<1x128x128xf32>
    %51 = vector.shape_cast %50 : vector<1x128x128xf32> to vector<128x128xf32>
    %cst_35 = arith.constant dense<0.000000e+00> : vector<16x128xf32>
    %52 = tpu.matmul %42, %51, %cst_35 {dimension_numbers = #tpu.dot_dimension_numbers<[1], [0], [0], [1], [0, 0, 1, 1], [], []>} : vector<16x128xf32>, vector<128x128xf32>, vector<16x128xf32> -> vector<16x128xf32>
    %53 = arith.addf %49, %52 : vector<16x128xf32>
    %c0_36 = arith.constant 0 : index
    %c0_37 = arith.constant 0 : index
    %54 = vector.load %arg5[%c0_36, %c0_37] : memref<1x128xf32, #tpu.memory_space<vmem>>, vector<1x128xf32>
    %55 = vector.broadcast %54 : vector<1x128xf32> to vector<16x128xf32>
    %56 = arith.addf %53, %55 : vector<16x128xf32>
    %cst_38 = arith.constant 0.000000e+00 : f32
    %57 = vector.broadcast %cst_38 : f32 to vector<16x128xf32>
    %58 = arith.cmpf ogt, %56, %57 : vector<16x128xf32>
    %cst_39 = arith.constant 0.00999999977 : f32
    %59 = vector.broadcast %cst_39 : f32 to vector<16x128xf32>
    %60 = arith.mulf %59, %56 : vector<16x128xf32>
    %61 = arith.select %58, %56, %60 : vector<16x128xi1>, vector<16x128xf32>
    %c0_40 = arith.constant 0 : index
    %c0_41 = arith.constant 0 : index
    %62 = vector.load %arg6[%c0_40, %c0_41] : memref<64x128xf32, #tpu.memory_space<vmem>>, vector<64x128xf32>
    %cst_42 = arith.constant dense<0.000000e+00> : vector<16x128xf32>
    %63 = tpu.matmul %1, %62, %cst_42 {dimension_numbers = #tpu.dot_dimension_numbers<[1], [0], [0], [1], [0, 0, 1, 1], [], []>} : vector<16x64xf32>, vector<64x128xf32>, vector<16x128xf32> -> vector<16x128xf32>
    %c0_43 = arith.constant 0 : index
    %c0_44 = arith.constant 0 : index
    %64 = vector.load %arg7[%c0_43, %c0_44] : memref<1x128xf32, #tpu.memory_space<vmem>>, vector<1x128xf32>
    %65 = vector.broadcast %64 : vector<1x128xf32> to vector<16x128xf32>
    %66 = arith.addf %63, %65 : vector<16x128xf32>
    %67 = arith.addf %61, %66 : vector<16x128xf32>
    %cst_45 = arith.constant 0.000000e+00 : f32
    %68 = vector.broadcast %cst_45 : f32 to vector<16x128xf32>
    %69 = arith.maximumf %67, %68 : vector<16x128xf32>
    %c0_46 = arith.constant 0 : index
    %c0_47 = arith.constant 0 : index
    %c0_48 = arith.constant 0 : index
    %70 = vector.load %arg8[%c0_46, %c0_47, %c0_48] : memref<1x16x128xf32, #tpu.memory_space<vmem>>, vector<1x16x128xf32>
    %71 = vector.shape_cast %70 : vector<1x16x128xf32> to vector<16x128xf32>
    %72 = vector.shape_cast %69 : vector<16x128xf32> to vector<1x16x128xf32>
    tpu.vector_store %arg8[%c0_46, %c0_47, %c0_48], %72 {strides = array<i32>} : memref<1x16x128xf32, #tpu.memory_space<vmem>>, vector<1x16x128xf32>,
    %73 = vector.shape_cast %69 : vector<16x128xf32> to vector<8x2x128xf32>
    %74 = vector.extract_strided_slice %73 {offsets = [0, 0, 0], sizes = [8, 1, 128], strides = [1, 1, 1]} : vector<8x2x128xf32> to vector<8x1x128xf32>
    %75 = vector.shape_cast %74 : vector<8x1x128xf32> to vector<8x128xf32>
    %76 = vector.extract_strided_slice %73 {offsets = [0, 1, 0], sizes = [8, 1, 128], strides = [1, 1, 1]} : vector<8x2x128xf32> to vector<8x1x128xf32>
    %77 = vector.shape_cast %76 : vector<8x1x128xf32> to vector<8x128xf32>
    %78 = arith.maximumf %75, %77 : vector<8x128xf32>
    %c120_i32 = arith.constant 120 : i32
    %79 = tpu.dynamic_rotate %78 by %c120_i32 dim 1 : vector<8x128xf32>, i32 -> vector<8x128xf32>
    %80 = arith.maximumf %78, %79 : vector<8x128xf32>
    %c0_49 = arith.constant 0 : index
    %c0_50 = arith.constant 0 : index
    %c0_51 = arith.constant 0 : index
    %81 = vector.load %arg9[%c0_49, %c0_50, %c0_51] : memref<1x8x128xf32, #tpu.memory_space<vmem>>, vector<1x8x128xf32>
    %82 = vector.shape_cast %81 : vector<1x8x128xf32> to vector<8x128xf32>
    %83 = vector.shape_cast %80 : vector<8x128xf32> to vector<1x8x128xf32>
    tpu.vector_store %arg9[%c0_49, %c0_50, %c0_51], %83 {strides = array<i32>} : memref<1x8x128xf32, #tpu.memory_space<vmem>>, vector<1x8x128xf32>,
    return
  }
  func.func @transform_0(%arg0: i32) -> (i32, i32, i32) {
    %c0_i32 = arith.constant 0 : i32
    %c0_i32_0 = arith.constant 0 : i32
    %c0_i32_1 = arith.constant 0 : i32
    return %arg0, %c0_i32, %c0_i32_0 : i32, i32, i32
  }
  func.func @transform_1(%arg0: i32) -> (i32, i32, i32) {
    %c0_i32 = arith.constant 0 : i32
    %c0_i32_0 = arith.constant 0 : i32
    %c0_i32_1 = arith.constant 0 : i32
    %c0_i32_2 = arith.constant 0 : i32
    return %c0_i32, %c0_i32_0, %c0_i32_1 : i32, i32, i32
  }
  func.func @transform_2(%arg0: i32) -> (i32, i32) {
    %c0_i32 = arith.constant 0 : i32
    %c0_i32_0 = arith.constant 0 : i32
    %c0_i32_1 = arith.constant 0 : i32
    return %c0_i32, %c0_i32_0 : i32, i32
  }
  func.func @transform_3(%arg0: i32) -> (i32, i32, i32) {
    %c0_i32 = arith.constant 0 : i32
    %c0_i32_0 = arith.constant 0 : i32
    %c0_i32_1 = arith.constant 0 : i32
    %c0_i32_2 = arith.constant 0 : i32
    return %c0_i32, %c0_i32_0, %c0_i32_1 : i32, i32, i32
  }
  func.func @transform_4(%arg0: i32) -> (i32, i32) {
    %c0_i32 = arith.constant 0 : i32
    %c0_i32_0 = arith.constant 0 : i32
    %c0_i32_1 = arith.constant 0 : i32
    return %c0_i32, %c0_i32_0 : i32, i32
  }
  func.func @transform_5(%arg0: i32) -> (i32, i32) {
    %c0_i32 = arith.constant 0 : i32
    %c0_i32_0 = arith.constant 0 : i32
    %c0_i32_1 = arith.constant 0 : i32
    return %c0_i32, %c0_i32_0 : i32, i32
  }
  func.func @transform_6(%arg0: i32) -> (i32, i32) {
    %c0_i32 = arith.constant 0 : i32
    %c0_i32_0 = arith.constant 0 : i32
    %c0_i32_1 = arith.constant 0 : i32
    return %c0_i32, %c0_i32_0 : i32, i32
  }
  func.func @transform_7(%arg0: i32) -> (i32, i32, i32) {
    %c0_i32 = arith.constant 0 : i32
    %c0_i32_0 = arith.constant 0 : i32
    %c0_i32_1 = arith.constant 0 : i32
    return %arg0, %c0_i32, %c0_i32_0 : i32, i32, i32
  }
  func.func @transform_8(%arg0: i32) -> (i32, i32, i32) {
    %c0_i32 = arith.constant 0 : i32
    %c0_i32_0 = arith.constant 0 : i32
    %c0_i32_1 = arith.constant 0 : i32
    return %arg0, %c0_i32, %c0_i32_0 : i32, i32, i32
  }
}

</mosaic_0001>

<bundles_post_ra>
// kernel: tpu_custom_call.1
= control target key start
LH: loop header
LB: loop body
LE: loop exit
PB: predicated region body
PF: predicated region fallthrough
CT: control target
= control target key end

     0   :  { %14 = vsyncpa [#allocation3], 0  ;;  %s2789_s0 = inlined_call_operand.hbm [shape: f32[2,16,64], index: 0, kind: input, shape index: {}]   ;;  %s2790_s1 = inlined_call_operand.hbm [shape: f32[3,64,128], index: 1, kind: input, shape index: {}]   ;;  %s2791_s2 = inlined_call_operand.vmem [shape: f32[1,128], index: 2, kind: input, shape index: {}]   ;;  %s2792_s3 = inlined_call_operand.hbm [shape: f32[3,128,128], index: 3, kind: input, shape index: {}]   ;;  %s2793_s4 = inlined_call_operand.vmem [shape: f32[1,128], index: 4, kind: input, shape index: {}]   ;;  %s2794_s5 = inlined_call_operand.hbm [shape: f32[64,128], index: 5, kind: input, shape index: {}]   ;;  %s2795_s6 = inlined_call_operand.vmem [shape: f32[1,128], index: 6, kind: input, shape index: {}]   ;;  %s2796_s7 = inlined_call_operand.hbm [shape: f32[2,16,128], index: 7, kind: output, shape index: {0}]   ;;  %s2797_s8 = inlined_call_operand.hbm [shape: f32[2,8,128], index: 8, kind: output, shape index: {1}]  }
   0x1   :  { %16 = vsyncpa [#allocation3 + $0x1], 0 }
   0x2   :  { %17 = vsyncpa [#allocation6], 0 }
   0x3   :  { %18 = vsyncpa [#allocation9], 0 }
   0x4   :  { %19 = vsyncpa [#allocation4], 0 }
   0x5   :  { %21 = vsyncpa [#allocation4 + $0x1], 0 }
   0x6   :  { %22 = vsyncpa [#allocation12], 0 }
   0x7   :  { %24 = vsyncpa [#allocation12 + $0x1], 0  ;;  %s2331_s27 = smov 0   ;;  %s2333_s28 = smov 0  }
   0x8   :  { %s2335_s29 = smov 0   ;;  %s2337_s30 = smov 0  }
   0x9 LB: > { %2803 = sst [smem:[#allocation18_spill]] %s2260_s27  ;;  %s2352_s9 = sadd.s32 4294967295, %s2272_s30   ;;  %s2272_s30 = sphi %s2337_s30, %s2826_s30   ;;  %s2268_s29 = sphi %s2335_s29, %s2825_s29   ;;  %s2264_s28 = sphi %s2333_s28, %s2824_s28   ;;  %s2260_s27 = sphi %s2331_s27, %s2823_s27  }
   0xa   : > { %s1475_s10 = sadd.s32 4294967294, %s2272_s30   ;;  %p50_p0 = scmp.ne.s32.totalorder %s2264_s28, %s2260_s27 }
   0xb   : > { %p2798_p1 = scmp.eq.s32.totalorder %s2352_s9, 0  ;;  %p206_p3 = scmp.eq.s32.totalorder %s1475_s10, 1 }
   0xc   : > { %p1476_p5 = scmp.ge.s32.totalorder %s2272_s30, 1  ;;  %p239_p7 = scmp.lt.s32.totalorder %s2272_s30, 3 }
   0xd   : > { %p2361_p4 = por %p2798_p1, %p50_p0  ;;  %p2366_p6 = por %p206_p3, %p50_p0 }
   0xe   : > { %p2371_p8 = pnand %p1476_p5, %p239_p7  ;;  %s2274_s14 = smov [#allocation5]  }
   0xf   : > { %s2804_s11 = scalar_select %p2361_p4, 1, 0 }
  0x10   : > { %s2805_s12 = scalar_select %p2366_p6, 1, 0 }
  0x11   : > { %s2807_s13 = scalar_select %p2371_p8, 1, 0 }
  0x12   : > { %2806 = sst [smem:[#allocation19_spill]] %s2805_s12  ;;  %s251_s15 = sshll.u32 %s2274_s14, 4  ;;  %s2375_s15 = int_to_ptr.vmem [resolvable:$true] %s251_s15 }
  0x13   : > { %p1982_p9 = pneg %p2371_p8  ;;  %s2275_s17 = smov [#allocation7]  }
  0x14   : > { %s267_s18 = sshll.u32 %s2275_s17, 4  ;;  %s2276_s19 = smov [#allocation8]   ;;  %s2386_s18 = int_to_ptr.vmem [resolvable:$true] %s267_s18 }
  0x15   : > { %p2382_p11 = pnand %p1982_p9, %p2798_p1  ;;  %s2388_s20 = sshll.u32 %s2276_s19, 4  ;;  %s284_s20 = int_to_ptr.vmem [resolvable:$true] %s2388_s20 }
  0x16   : > { %s2052_s23 = scalar_lea.hbm %s2790_s1, 3072 }
  0x17   : > { %p2053_p12 = scmp.ne.s32.totalorder %s2790_s1, %s2052_s23  ;;  %p2398_p13 = pneg %p2382_p11 }
  0x18   : > { %p2059_p5 = scmp.lt.u32.totalorder %s2052_s23, %s2790_s1 }
  0x19   : > { %p2055_p0 = pnand %p2398_p13, %p2053_p12 }
  0x1b   : > { %p2056_p3 = pneg %p2055_p0 }
  0x1d   : > { %p2061_p7 = pnand %p2059_p5, %p2056_p3 }
  0x1f   : > { %2064 = shalt.err (!%p2061_p7)
}
  0x20   : > { %s2065_s17 = scalar_lea.vmem %s2375_s15, 3072  ;;  %p2073_p2 = scmp.lt.s32.totalorder %s2375_s15, %s2375_s15 }
  0x21   : > { %p2066_p9 = scmp.ne.s32.totalorder %s2375_s15, %s2065_s17  ;;  %p2074_p6 = scmp.lt.s32.totalorder %s2065_s17, %s2065_s17 }
  0x23   : > { %p2068_p10 = pnand %p2066_p9, %p2398_p13  ;;  %p2075_p12 = por %p2074_p6, %p2073_p2 }
  0x25   : > { %p2069_p1 = pneg %p2068_p10 }
  0x27   : > { %p2076_p0 = pnand %p2075_p12, %p2069_p1 }
  0x29   : > { %2079 = shalt.err (!%p2076_p0)
}
  0x2a   : > { %s2277_s19 = smov 128   ;;  %s2278_s21 = smov 8  }
  0x2b   : > { %1985 = dma.hbm_to_vmem [thread:$0]  (!%p2382_p11), %s2790_s1, 3072, %s2375_s15, [#allocation6], %s2277_s19, %s2277_s19, %s2278_s21  }
  0x2c   : > { %s2080_s10 = scalar_lea.hbm %s2792_s3, 6144 }
  0x2d   : > { %p2081_p1 = scmp.ne.s32.totalorder %s2792_s3, %s2080_s10  ;;  %p2087_p10 = scmp.lt.u32.totalorder %s2080_s10, %s2792_s3 }
  0x2f   : > { %p2083_p2 = pnand %p2081_p1, %p2398_p13 }
  0x31   : > { %p2084_p6 = pneg %p2083_p2 }
  0x33   : > { %p2089_p3 = pnand %p2087_p10, %p2084_p6 }
  0x35   : > { %2092 = shalt.err (!%p2089_p3)
}
  0x36   : > { %s2093_s15 = scalar_lea.vmem %s2386_s18, 6144  ;;  %p2101_p12 = scmp.lt.s32.totalorder %s2386_s18, %s2386_s18 }
  0x37   : > { %p2094_p5 = scmp.ne.s32.totalorder %s2386_s18, %s2093_s15  ;;  %p2102_p0 = scmp.lt.s32.totalorder %s2093_s15, %s2093_s15 }
  0x39   : > { %p2096_p7 = pnand %p2094_p5, %p2398_p13  ;;  %p2103_p1 = por %p2102_p0, %p2101_p12 }
  0x3b   : > { %p2097_p9 = pneg %p2096_p7 }
  0x3d   : > { %p2104_p2 = pnand %p2103_p1, %p2097_p9 }
  0x3f   : > { %2107 = shalt.err (!%p2104_p2)
}
  0x40   : > { %1988 = dma.hbm_to_vmem [thread:$0]  (!%p2382_p11), %s2792_s3, 6144, %s2386_s18, [#allocation6], %s2277_s19, %s2277_s19, %s2278_s21  }
  0x41   : > { %s2108_s24 = scalar_lea.hbm %s2794_s5, 1024 }
  0x42   : > { %p2109_p6 = scmp.ne.s32.totalorder %s2794_s5, %s2108_s24  ;;  %p2115_p5 = scmp.lt.u32.totalorder %s2108_s24, %s2794_s5 }
  0x44   : > { %p2111_p10 = pnand %p2109_p6, %p2398_p13 }
  0x46   : > { %p2112_p3 = pneg %p2111_p10 }
  0x48   : > { %p2117_p7 = pnand %p2115_p5, %p2112_p3 }
  0x4a   : > { %2120 = shalt.err (!%p2117_p7)
}
  0x4b   : > { %s2121_s15 = scalar_lea.vmem %s284_s20, 1024  ;;  %p2129_p1 = scmp.lt.s32.totalorder %s284_s20, %s284_s20 }
  0x4c   : > { %p2122_p9 = scmp.ne.s32.totalorder %s284_s20, %s2121_s15  ;;  %p2130_p2 = scmp.lt.s32.totalorder %s2121_s15, %s2121_s15 }
  0x4e   : > { %p2124_p12 = pnand %p2122_p9, %p2398_p13  ;;  %p2131_p4 = por %p2130_p2, %p2129_p1 }
  0x50   : > { %p2125_p0 = pneg %p2124_p12 }
  0x52   : > { %p2132_p8 = pnand %p2131_p4, %p2125_p0 }
  0x54   : > { %2135 = shalt.err (!%p2132_p8)
}
  0x55   : > { %1991 = dma.hbm_to_vmem [thread:$0]  (!%p2382_p11), %s2794_s5, 1024, %s284_s20, [#allocation9], %s2277_s19, %s2277_s19, %s2278_s21  }
  0x56   : > { %s2471_s26 = sadd.s32 1, %s2272_s30   ;;  %s37_s12 = sadd.s32 1, %s2268_s29 }
  0x57   : > { %s34_s16 = ssub.s32 %s2272_s30, %s2471_s26  ;;  %p44_p8 = scmp.ne.s32.totalorder %s2268_s29, %s2264_s28 }
  0x58   : > { %p35_p4 = scmp.eq.s32.totalorder %s34_s16, 0  ;;  %p45_p13 = scmp.eq.s32.totalorder %s2272_s30, 0 }
  0x59   : > { %p2006_p6 = scmp.lt.s32.totalorder %s2272_s30, 2  ;;  %p2810_p3 = scmp.eq.s32.totalorder %s2352_s9, 1 }
  0x5a   : > { %s2481_s22 = scalar_select %p35_p4, %s2268_s29, %s37_s12  }
  0x5b   : > { %p46_p10 = por %p45_p13, %p44_p8  ;;  %p2485_p5 = por %p2810_p3, %p44_p8 }
  0x5c   : > { %s300_s24 = sand.u32 1, %s2268_s29   ;;  %s1519_s25 = sshll.u32 %s2272_s30, 8 }
  0x5d   : > { %s1481_s20 = sshll.u32 %s300_s24, 4  ;;  %s2494_s17 = scalar_lea.hbm %s2789_s0, %s1519_s25 }
  0x5e   : > { %s304_s15 = scalar_lea.vmem [#allocation2], %s1481_s20  ;;  %p2496_p11 = pnand %p2006_p6, %p46_p10 }
  0x5f   : > { %s311_s18 = sshll.u32 %s304_s15, 4  ;;  %s2502_s16 = scalar_lea.sflag [#allocation3], %s300_s24  ;;  %s2500_s18 = int_to_ptr.vmem [resolvable:$true] %s311_s18 }
  0x60   : > { %s2136_s12 = scalar_lea.hbm %s2494_s17, 256  ;;  %p2138_p9 = pneg %p2496_p11 }
  0x61   : > { %p2137_p7 = scmp.ne.s32.totalorder %s2494_s17, %s2136_s12  ;;  %s2141_s10 = scalar_lea.hbm %s2789_s0, 512 }
  0x62   : > { %p2142_p1 = scmp.lt.u32.totalorder %s2494_s17, %s2789_s0  ;;  %p2143_p2 = scmp.lt.u32.totalorder %s2141_s10, %s2136_s12 }
  0x63   : > { %p2139_p12 = pnand %p2138_p9, %p2137_p7  ;;  %p2145_p8 = scmp.lt.u32.totalorder %s2136_s12, %s2494_s17 }
  0x64   : > { %p2144_p4 = por %p2143_p2, %p2142_p1 }
  0x65   : > { %p2140_p0 = pneg %p2139_p12 }
  0x66   : > { %p2146_p13 = por %p2145_p8, %p2144_p4 }
  0x68   : > { %p2147_p6 = pnand %p2146_p13, %p2140_p0 }
  0x6a   : > { %2150 = shalt.err (!%p2147_p6)
}
  0x6b   : > { %s2151_s24 = scalar_lea.vmem %s2500_s18, 256  ;;  %s2279_s25 = smov [#allocation2]  }
  0x6c   : > { %p2152_p10 = scmp.ne.s32.totalorder %s2500_s18, %s2151_s24  ;;  %s2156_s20 = sshll.u32 %s2279_s25, 4  ;;  %s2157_s20 = int_to_ptr.vmem [resolvable:$false] %s2156_s20 }
  0x6d   : > { %s2158_s14 = scalar_lea.vmem %s2157_s20, 512  ;;  %p2159_p12 = scmp.lt.s32.totalorder %s2500_s18, %s2157_s20 }
  0x6e   : > { %p2154_p3 = pnand %p2152_p10, %p2138_p9  ;;  %p2160_p1 = scmp.lt.s32.totalorder %s2158_s14, %s2151_s24 }
  0x70   : > { %p2155_p7 = pneg %p2154_p3  ;;  %p2161_p2 = por %p2160_p1, %p2159_p12 }
  0x72   : > { %p2162_p4 = pnand %p2161_p2, %p2155_p7 }
  0x74   : > { %2165 = shalt.err (!%p2162_p4)
}
  0x75   : > { %1995 = dma.hbm_to_vmem [thread:$0]  (!%p2496_p11), %s2494_s17, 256, %s2500_s18, %s2502_s16, %s2277_s19, %s2277_s19, %s2278_s21  }
  0x76   : > { %p2813_p9 = scmp.ne.s32.totalorder %s2807_s13, 0 }
  0x77   : > { %s2536_s12 = sand.u32 (!%p2813_p9), 1, %s2264_s28   ;;  %p2814_p0 = scmp.ne.s32.totalorder (!%p2813_p9), %s2804_s11, 0 }
  0x78   : > { %323 = sbr.rel (%p2813_p9) target bundleno = 852 (0x354), region = 48  ;;  %s1485_s10 = sshll.u32 (!%p2813_p9), %s2536_s12, 4 }
  0x79   : > { %s326_s15 = scalar_lea.sflag (!%p2813_p9), [#allocation3], %s2536_s12  ;;  %s329_s27 = scalar_lea.vmem (!%p2813_p9), [#allocation2], %s1485_s10 }
  0x7f   : > { %2239 = dma.done.wait (%p2814_p0), %s326_s15, 256  }
  0x80   : > { %2241 = vsyncadd (%p2814_p0), %s326_s15, 4294967040  ;;  %p2815_p11 = scmp.eq.s32.totalorder %s2352_s9, 0 }
  0x82   : > { %2243 = dma.done.wait (%p2815_p11), [#allocation6], 9216   ;;  %p2816_p8 = pmov %p2815_p11 }
  0x84   : > { %2245 = vsyncadd (%p2816_p8), [#allocation6], 4294958080  ;;  %p2817_p13 = pmov %p2816_p8 }
  0x85   : > { %p2818_p6 = pmov %p2816_p8 }
  0x86   : > { %2247 = dma.done.wait (%p2817_p13), [#allocation9], 1024  }
  0x87   : > { %2249 = vsyncadd (%p2818_p6), [#allocation9], 4294966272  ;;  %v411_v0 = vld [vmem:[#allocation5 + $0x40] sm:$0xff]  ;;  %v412_v1 = vld [vmem:[#allocation5 + $0x48] sm:$0xff]  ;;  %vm419_vm0 = vcmask 523264   ;;  %v381_v9 = vlaneseq  ;;  %s2632_s16 = scalar_lea.vmem [#allocation10], %s1485_s10 }
  0x88   : > { %v413_v2 = vld [vmem:[#allocation5 + $0x50] sm:$0xff]  ;;  %v1796_v3 = vpack.c.bf16 %v412_v1, %v411_v0  ;;  %v414_v4 = vld [vmem:[#allocation5 + $0x58] sm:$0xff]  ;;  %v415_v6 = vld [vmem:[#allocation5 + $0x60] sm:$0xff]  ;;  %vm1205_vm9 = vcmask 1041409   ;;  %vm1207_vm10 = vcmask 1042434   ;;  %vm1209_vm11 = vcmask 1043459  }
  0x89   : > { %v1800_v5 = vpack.c.bf16 %v414_v4, %v413_v2  ;;  %v416_v7 = vld [vmem:[#allocation5 + $0x68] sm:$0xff]  ;;  %v2554_v8 = vld [vmem:[%s329_s27] sm:$0xff]  ;;  %v418_v12 = vld [vmem:[#allocation5 + $0x78] sm:$0xff]  ;;  %v2558_v13 = vshrl.u32 %v381_v9, 7  ;;  %vm1211_vm12 = vcmask 1044484   ;;  %vm1213_vm13 = vcmask 1045509  }
  0x8a   : > { %1797 = vmatprep.subr.bf16.mxu0 %v1796_v3  ;;  %1631 = vmatprep.mubr.msk.f32.mxu0 %vm419_vm0, %v2554_v8  ;;  %v1804_v10 = vpack.c.bf16 %v416_v7, %v415_v6  ;;  %v417_v11 = vld [vmem:[#allocation5 + $0x70] sm:$0xff]  ;;  %v2560_v14 = vld [vmem:[%s329_s27 + $0x8] sm:$0xff]  ;;  %v718_v15 = vld [vmem:[#allocation7 + $0x80] sm:$0xff]  ;;  %v386_v20 = vrot.slane %v2554_v8, 7  ;;  %v395_v54 = vrot.slane %v2554_v8, 1  ;;  %s1328_s24 = sshll.u32 %s2632_s16, 4  ;;  %s2681_s24 = int_to_ptr.vmem [resolvable:$true] %s1328_s24 }
  0x8b   : > { %1799 = vmatpush3.bf16.msra.mxu0 %v1796_v3  ;;  %v1808_v16 = vpack.c.bf16 %v418_v12, %v417_v11  ;;  %v719_v17 = vld [vmem:[#allocation7 + $0x88] sm:$0xff]  ;;  %v720_v18 = vld [vmem:[#allocation7 + $0x90] sm:$0xff]  ;;  %v721_v19 = vld [vmem:[#allocation7 + $0x98] sm:$0xff]  ;;  %v387_v23 = vrot.slane %v2560_v14, 7  ;;  %vm388_vm1 = vcmp.lt.s32.totalorder %v2558_v13, 1  ;;  %vm384_vm2 = vcmp.gt.s32.totalorder %v2558_v13, 0 }
  0x8c   : > { %1801 = vmatprep.subr.bf16.mxu0 %v1800_v5  ;;  %v402_v21 = vld [vmem:[#allocation5] sm:$0xff]  ;;  %v403_v22 = vld [vmem:[#allocation5 + $0x8] sm:$0xff]  ;;  %v1844_v24 = vpack.c.bf16 %v719_v17, %v718_v15  ;;  %v1848_v25 = vpack.c.bf16 %v721_v19, %v720_v18  ;;  %v404_v29 = vld [vmem:[#allocation5 + $0x10] sm:$0xff]  ;;  %v396_v55 = vrot.slane %v2560_v14, 1  ;;  %vm397_vm3 = vcmp.lt.s32.totalorder %v2558_v13, 7  ;;  %s1520_s25 = sshll.u32 %s2352_s9, 8 }
  0x8d   : > { %v722_v26 = vld [vmem:[#allocation7 + $0xa0] sm:$0xff]  ;;  %v723_v27 = vld [vmem:[#allocation7 + $0xa8] sm:$0xff]  ;;  %v1812_v28 = vpack.c.bf16 %v403_v22, %v402_v21  ;;  %v405_v30 = vld [vmem:[#allocation5 + $0x18] sm:$0xff]  ;;  %v390_v31 = vsel %vm388_vm1, %v387_v23, %v386_v20  ;;  %v389_v60 = vsel %vm388_vm1, %v386_v20, %v387_v23  ;;  %vm1215_vm14 = vcmask 1046534   ;;  %s2281_s20 = smov 120   ;;  %s2689_s15 = scalar_lea.hbm %s2796_s7, %s1520_s25 }
  0x8e   : > { %1845 = vmatprep.subr.bf16.mxu1 %v1844_v24  ;;  %v1852_v32 = vpack.c.bf16 %v723_v27, %v722_v26  ;;  %v724_v33 = vld [vmem:[#allocation7 + $0xb0] sm:$0xff]  ;;  %v725_v34 = vld [vmem:[#allocation7 + $0xb8] sm:$0xff]  ;;  %v1816_v35 = vpack.c.bf16 %v405_v30, %v404_v29  ;;  %v391_v36 = vsel %vm384_vm2, %v390_v31, 0.0  ;;  %v406_v37 = vld [vmem:[#allocation5 + $0x20] sm:$0xff]  ;;  %v398_v62 = vsel %vm397_vm3, %v395_v54, %v396_v55  ;;  %s1310_s27 = scalar_lea.sflag [#allocation4], %s2536_s12  ;;  %s2166_s11 = scalar_lea.vmem %s2681_s24, 256 }
  0x8f   : > { %1803 = vmatpush3.bf16.msra.mxu0 %v1800_v5  ;;  %1847 = vmatpush3.bf16.msra.mxu1 %v1844_v24  ;;  %v407_v38 = vld [vmem:[#allocation5 + $0x28] sm:$0xff]  ;;  %v1856_v39 = vpack.c.bf16 %v725_v34, %v724_v33  ;;  %v726_v40 = vld [vmem:[#allocation7 + $0xc0] sm:$0xff]  ;;  %v408_v43 = vld [vmem:[#allocation5 + $0x30] sm:$0xff]  ;;  %v2591_v5 = vadd.s32 8, %v2558_v13  ;;  %v399_v6 = vsel %vm397_vm3, %v396_v55, %v395_v54  ;;  %vm1217_vm15 = vcmask 1047559   ;;  %p2167_p10 = scmp.ne.s32.totalorder %s2681_s24, %s2166_s11  ;;  %s2282_s13 = smov [#allocation10]  }
  0x90   : > { %1805 = vmatprep.subr.bf16.mxu0 %v1804_v10  ;;  %1849 = vmatprep.subr.bf16.mxu1 %v1848_v25  ;;  %v727_v41 = vld [vmem:[#allocation7 + $0xc8] sm:$0xff]  ;;  %v1820_v42 = vpack.c.bf16 %v407_v38, %v406_v37  ;;  %v409_v44 = vld [vmem:[#allocation5 + $0x38] sm:$0xff]  ;;  %v728_v46 = vld [vmem:[#allocation7 + $0xd0] sm:$0xff]  ;;  %s2170_s19 = sshll.u32 %s2282_s13, 4  ;;  %s2171_s19 = int_to_ptr.vmem [resolvable:$false] %s2170_s19 }
  0x91   : > { %v1860_v45 = vpack.c.bf16 %v727_v41, %v726_v40  ;;  %v729_v47 = vld [vmem:[#allocation7 + $0xd8] sm:$0xff]  ;;  %v1824_v48 = vpack.c.bf16 %v409_v44, %v408_v43  ;;  %v583_v49 = vld [vmem:[#allocation5 + $0x80] sm:$0xff]  ;;  %v584_v50 = vld [vmem:[#allocation5 + $0x88] sm:$0xff]  ;;  %vm394_vm4 = vcmp.lt.s32.totalorder %v2591_v5, 15  ;;  %p2168_p3 = pnand %p2167_p10, %p2485_p5  ;;  %s2172_s21 = scalar_lea.vmem %s2171_s19, 512 }
  0x92   : > { %v1864_v51 = vpack.c.bf16 %v729_v47, %v728_v46  ;;  %v730_v52 = vld [vmem:[#allocation7 + $0xe0] sm:$0xff]  ;;  %v731_v53 = vld [vmem:[#allocation7 + $0xe8] sm:$0xff]  ;;  %v1828_v56 = vpack.c.bf16 %v584_v50, %v583_v49  ;;  %v585_v57 = vld [vmem:[#allocation5 + $0x90] sm:$0xff]  ;;  %v401_v7 = vsel %vm394_vm4, %v399_v6, 0.0  ;;  %p2173_p12 = scmp.lt.s32.totalorder %s2681_s24, %s2171_s19  ;;  %p2174_p1 = scmp.lt.s32.totalorder %s2172_s21, %s2166_s11 }
  0x93   : > { %1807 = vmatpush3.bf16.msra.mxu0 %v1804_v10  ;;  %1851 = vmatpush3.bf16.msra.mxu1 %v1848_v25  ;;  %v586_v58 = vld [vmem:[#allocation5 + $0x98] sm:$0xff]  ;;  %v1868_v59 = vpack.c.bf16 %v731_v53, %v730_v52  ;;  %v587_v63 = vld [vmem:[#allocation5 + $0xa0] sm:$0xff]  ;;  %v588_v0 = vld [vmem:[#allocation5 + $0xa8] sm:$0xff]  ;;  %p2169_p7 = pneg %p2168_p3 }
  0x94   : > { %1809 = vmatprep.subr.bf16.mxu0 %v1808_v16  ;;  %1853 = vmatprep.subr.bf16.mxu1 %v1852_v32  ;;  %v1832_v61 = vpack.c.bf16 %v586_v58, %v585_v57  ;;  %v1836_v1 = vpack.c.bf16 %v588_v0, %v587_v63  ;;  %v589_v2 = vld [vmem:[#allocation5 + $0xb0] sm:$0xff]  ;;  %v590_v3 = vld [vmem:[#allocation5 + $0xb8] sm:$0xff]  ;;  %v701_v12 = vld [vmem:[#allocation7] sm:$0xff]  ;;  %p2175_p2 = por %p2174_p1, %p2173_p12 }
  0x95   : > { %v1840_v4 = vpack.c.bf16 %v590_v3, %v589_v2  ;;  %v732_v9 = vld [vmem:[#allocation7 + $0xf0] sm:$0xff]  ;;  %v733_v10 = vld [vmem:[#allocation7 + $0xf8] sm:$0xff]  ;;  %v702_v15 = vld [vmem:[#allocation7 + $0x8] sm:$0xff] }
  0x96   : > { %v1872_v11 = vpack.c.bf16 %v733_v10, %v732_v9  ;;  %v993_v17 = vld [vmem:[#allocation8] sm:$0xff]  ;;  %v994_v18 = vld [vmem:[#allocation8 + $0x8] sm:$0xff]  ;;  %v995_v20 = vld [vmem:[#allocation8 + $0x10] sm:$0xff]  ;;  %p2176_p4 = pnand %p2175_p2, %p2169_p7 }
  0x97   : > { %1811 = vmatpush3.bf16.msra.mxu0 %v1808_v16  ;;  %1855 = vmatpush3.bf16.msra.mxu1 %v1852_v32  ;;  %v1876_v16 = vpack.c.bf16 %v702_v15, %v701_v12  ;;  %v1940_v19 = vpack.c.bf16 %v994_v18, %v993_v17  ;;  %v996_v21 = vld [vmem:[#allocation8 + $0x18] sm:$0xff]  ;;  %v998_v23 = vld [vmem:[#allocation8 + $0x28] sm:$0xff]  ;;  %v999_v25 = vld [vmem:[#allocation8 + $0x30] sm:$0xff] }
  0x98   : > { %1813 = vmatprep.subr.bf16.mxu0 %v1812_v28  ;;  %1857 = vmatprep.subr.bf16.mxu1 %v1856_v39  ;;  %v1944_v22 = vpack.c.bf16 %v996_v21, %v995_v20  ;;  %v1000_v26 = vld [vmem:[#allocation8 + $0x38] sm:$0xff]  ;;  %v703_v34 = vld [vmem:[#allocation7 + $0x10] sm:$0xff]  ;;  %v705_v43 = vld [vmem:[#allocation7 + $0x20] sm:$0xff] }
  0x99   : > { %v1952_v27 = vpack.c.bf16 %v1000_v26, %v999_v25  ;;  %v706_v44 = vld [vmem:[#allocation7 + $0x28] sm:$0xff]  ;;  %v707_v50 = vld [vmem:[#allocation7 + $0x30] sm:$0xff]  ;;  %v709_v53 = vld [vmem:[#allocation7 + $0x40] sm:$0xff] }
  0x9a   : > { %1632 = vmatmul.mubr.msk.f32.vlgmr.msra.gmra.mrb[0].mxu0 %vm419_vm0, %v2560_v14  ;;  %v1884_v49 = vpack.c.bf16 %v706_v44, %v705_v43  ;;  %v710_v54 = vld [vmem:[#allocation7 + $0x48] sm:$0xff]  ;;  %v712_v57 = vld [vmem:[#allocation7 + $0x58] sm:$0xff]  ;;  %v889_v9 = vld [vmem:[#allocation7 + $0x120] sm:$0xff] }
  0x9b   : > { %1815 = vmatpush3.bf16.msra.mxu0 %v1812_v28  ;;  %1650 = vmatprep.mubr.msk.f32.mxu0 %vm419_vm0, %v391_v36  ;;  %v1497_v28 = vld [vmem:[%s2791_s2] ss:$0 sm:$0xff]  ;;  %v1892_v55 = vpack.c.bf16 %v710_v54, %v709_v53  ;;  %v716_v63 = vld [vmem:[#allocation7 + $0x78] sm:$0xff]  ;;  %v886_v2 = vld [vmem:[#allocation7 + $0x108] sm:$0xff] }
  0x9c   : > { %1817 = vmatprep.subr.bf16.mxu0 %v1816_v35  ;;  %1859 = vmatpush3.bf16.msra.mxu1 %v1856_v39  ;;  %v888_v6 = vld [vmem:[#allocation7 + $0x118] sm:$0xff]  ;;  %v890_v10 = vld [vmem:[#allocation7 + $0x128] sm:$0xff]  ;;  %v891_v12 = vld [vmem:[#allocation7 + $0x130] sm:$0xff] }
  0x9d   : > { %1861 = vmatprep.subr.bf16.mxu1 %v1860_v45  ;;  %v892_v15 = vld [vmem:[#allocation7 + $0x138] sm:$0xff]  ;;  %v893_v17 = vld [vmem:[#allocation7 + $0x140] sm:$0xff]  ;;  %v894_v18 = vld [vmem:[#allocation7 + $0x148] sm:$0xff] }
  0x9e   : > { %v895_v20 = vld [vmem:[#allocation7 + $0x150] sm:$0xff]  ;;  %v896_v21 = vld [vmem:[#allocation7 + $0x158] sm:$0xff] }
  0x9f   : > { %1819 = vmatpush3.bf16.msra.mxu0 %v1816_v35  ;;  %v704_v35 = vld [vmem:[#allocation7 + $0x18] sm:$0xff]  ;;  %v899_v25 = vld [vmem:[#allocation7 + $0x170] sm:$0xff] }
  0xa0   : > { %1821 = vmatprep.subr.bf16.mxu0 %v1820_v42  ;;  %1863 = vmatpush3.bf16.msra.mxu1 %v1860_v45  ;;  %v1880_v41 = vpack.c.bf16 %v704_v35, %v703_v34  ;;  %v900_v26 = vld [vmem:[#allocation7 + $0x178] sm:$0xff] }
  0xa1   : > { %1865 = vmatprep.subr.bf16.mxu1 %v1864_v51 }
  0xa3   : > { %1823 = vmatpush3.bf16.msra.mxu0 %v1820_v42 }
  0xa4   : > { %1825 = vmatprep.subr.bf16.mxu0 %v1824_v48  ;;  %1867 = vmatpush3.bf16.msra.mxu1 %v1864_v51  ;;  %v708_v51 = vld [vmem:[#allocation7 + $0x38] sm:$0xff] }
  0xa5   : > { %1869 = vmatprep.subr.bf16.mxu1 %v1868_v59  ;;  %v1888_v52 = vpack.c.bf16 %v708_v51, %v707_v50 }
  0xa7   : > { %1827 = vmatpush3.bf16.msra.mxu0 %v1824_v48 }
  0xa8   : > { %1829 = vmatprep.subr.bf16.mxu0 %v1828_v56  ;;  %1871 = vmatpush3.bf16.msra.mxu1 %v1868_v59  ;;  %v713_v59 = vld [vmem:[#allocation7 + $0x60] sm:$0xff] }
  0xa9   : > { %1873 = vmatprep.subr.bf16.mxu1 %v1872_v11 }
  0xaa   : > { %1651 = vmatmul.mubr.msk.f32.vlgmr.msra.gmra.mrb[0].mxu0 %vm419_vm0, %v389_v60  ;;  %v714_v60 = vld [vmem:[#allocation7 + $0x68] sm:$0xff] }
  0xab   : > { %1831 = vmatpush3.bf16.msra.mxu0 %v1828_v56  ;;  %1669 = vmatprep.mubr.msk.f32.mxu0 %vm419_vm0, %v398_v62  ;;  %v711_v56 = vld [vmem:[#allocation7 + $0x50] sm:$0xff] }
  0xac   : > { %1833 = vmatprep.subr.bf16.mxu0 %v1832_v61  ;;  %1875 = vmatpush3.bf16.msra.mxu1 %v1872_v11  ;;  %v1896_v58 = vpack.c.bf16 %v712_v57, %v711_v56  ;;  %v715_v62 = vld [vmem:[#allocation7 + $0x70] sm:$0xff]  ;;  %v1916_v11 = vpack.c.bf16 %v890_v10, %v889_v9  ;;  %v2641_v57 = vsub.s32 0, %v2558_v13 }
  0xad   : > { %1877 = vmatprep.subr.bf16.mxu1 %v1876_v16  ;;  %v1904_v0 = vpack.c.bf16 %v716_v63, %v715_v62 }
  0xaf   : > { %1835 = vmatpush3.bf16.msra.mxu0 %v1832_v61  ;;  %v1900_v61 = vpack.c.bf16 %v714_v60, %v713_v59 }
  0xb0   : > { %1837 = vmatprep.subr.bf16.mxu0 %v1836_v1 }
  0xb3   : > { %1839 = vmatpush3.bf16.msra.mxu0 %v1836_v1  ;;  %v885_v1 = vld [vmem:[#allocation7 + $0x100] sm:$0xff] }
  0xb4   : > { %1841 = vmatprep.subr.bf16.mxu0 %v1840_v4  ;;  %v1908_v3 = vpack.c.bf16 %v886_v2, %v885_v1 }
  0xb7   : > { %1843 = vmatpush3.bf16.msra.mxu0 %v1840_v4  ;;  %v887_v4 = vld [vmem:[#allocation7 + $0x110] sm:$0xff] }
  0xb8   : > { %1941 = vmatprep.subr.bf16.mxu0 %v1940_v19 }
  0xba   : > { %1670 = vmatmul.mubr.msk.f32.vlgmr.msra.gmra.mrb[0].mxu0 %vm419_vm0, %v401_v7  ;;  %v1912_v7 = vpack.c.bf16 %v888_v6, %v887_v4 }
  0xbb   : > { %1793 = vmatprep.mubr.msk.f32.mxu0 %vm419_vm0, %v2554_v8  ;;  %1943 = vmatpush3.bf16.msra.mxu0 %v1940_v19  ;;  %v997_v8 = vld [vmem:[#allocation8 + $0x20] sm:$0xff]  ;;  %v1924_v19 = vpack.c.bf16 %v894_v18, %v893_v17 }
  0xbc   : > { %1945 = vmatprep.subr.bf16.mxu0 %v1944_v22  ;;  %v1948_v24 = vpack.c.bf16 %v998_v23, %v997_v8  ;;  %v897_v8 = vld [vmem:[#allocation7 + $0x160] sm:$0xff]  ;;  %v898_v23 = vld [vmem:[#allocation7 + $0x168] sm:$0xff] }
  0xbf   : > { %1947 = vmatpush3.bf16.msra.mxu0 %v1944_v22  ;;  %v1928_v22 = vpack.c.bf16 %v896_v21, %v895_v20 }
  0xc0   : > { %1949 = vmatprep.subr.bf16.mxu0 %v1948_v24 }
  0xc3   : > { %1951 = vmatpush3.bf16.msra.mxu0 %v1948_v24  ;;  %v1932_v24 = vpack.c.bf16 %v898_v23, %v897_v8 }
  0xc4   : > { %1953 = vmatprep.subr.bf16.mxu0 %v1952_v27 }
  0xc7   : > { %1955 = vmatpush3.bf16.msra.mxu0 %v1952_v27  ;;  %v1936_v27 = vpack.c.bf16 %v900_v26, %v899_v25 }
  0xca   : > { %1794 = vmatmul.mubr.msk.f32.vlgmr.msra.gmra.mrb[2].mxu0 %vm419_vm0, %v2560_v14 }
 0x18d   : > { %v1671_v29 = vpop.f32.mrb[0].mxu0 }
 0x18e   : > { %v682_v30 = vadd.f32 %v1671_v29, %v1497_v28  ;;  %v663_v31 = vpop.f32.mrb[1].mxu0 }
 0x18f   : > { %v681_v32 = vadd.f32 %v1497_v28, %v663_v31  ;;  %v2280_v31 = vmov 1983009808  }
 0x190   : > { %v686_v33 = vmul.f32 0.01, %v682_v30  ;;  %vm684_vm5 = vcmp.gt.f32.partialorder %v682_v30, 0.0 }
 0x191   : > { %v685_v36 = vmul.f32 0.01, %v681_v32  ;;  %vm683_vm6 = vcmp.gt.f32.partialorder %v681_v32, 0.0 }
 0x192   : > { %v688_v37 = vsel %vm684_vm5, %v682_v30, %v686_v33  ;;  %v1500_v30 = vld [vmem:[%s2793_s4] ss:$0 sm:$0xff] }
 0x193   : > { %v687_v38 = vsel %vm683_vm6, %v681_v32, %v685_v36  ;;  %v690_v39 = vrot.slane %v688_v37, 7  ;;  %v696_v40 = vrot.slane %v688_v37, 1  ;;  %v1093_v32 = vunpack.c.l.s4 %v2280_v31  ;;  %v1501_v33 = vld [vmem:[%s2795_s6] ss:$0 sm:$0xff] }
 0x194   : > { %v689_v14 = vrot.slane %v687_v38, 7  ;;  %v695_v42 = vrot.slane %v687_v38, 1  ;;  %1704 = vmatprep.mubr.f32.mxu1 %v687_v38 }
 0x195   : > { %1705 = vmatmul.mubr.f32.vlgmr.msra.gmra.mrb[0].mxu1 %v688_v37  ;;  %v1094_v5 = vunpack.c.0.s8 %v1093_v32 }
 0x196   : > { %1879 = vmatpush3.bf16.msra.mxu1 %v1876_v16  ;;  %v692_v45 = vsel %vm388_vm1, %v690_v39, %v689_v14  ;;  %v691_v46 = vsel %vm388_vm1, %v689_v14, %v690_v39  ;;  %v697_v47 = vsel %vm397_vm3, %v695_v42, %v696_v40  ;;  %v2614_v48 = vsel %vm397_vm3, %v696_v40, %v695_v42 }
 0x197   : > { %1739 = vmatprep.mubr.msk.f32.mxu1 %vm384_vm2, %v692_v45  ;;  %1881 = vmatprep.subr.bf16.mxu1 %v1880_v41  ;;  %v1920_v16 = vpack.c.bf16 %v892_v15, %v891_v12  ;;  %v2628_v43 = vsub.s32 %v1094_v5, %v2558_v13 }
 0x19a   : > { %1883 = vmatpush3.bf16.msra.mxu1 %v1880_v41 }
 0x19b   : > { %1885 = vmatprep.subr.bf16.mxu1 %v1884_v49 }
 0x19d   : > { %v1795_v28 = vpop.f32.mrb[2].mxu0 }
 0x19e   : > { %1887 = vmatpush3.bf16.msra.mxu1 %v1884_v49  ;;  %v1074_v29 = vpop.f32.mrb[3].mxu0  ;;  %v1080_v38 = vadd.f32 %v1795_v28, %v1501_v33 }
 0x19f   : > { %1889 = vmatprep.subr.bf16.mxu1 %v1888_v52  ;;  %v1075_v40 = vadd.f32 %v1501_v33, %v1074_v29 }
 0x1a2   : > { %1891 = vmatpush3.bf16.msra.mxu1 %v1888_v52 }
 0x1a3   : > { %1893 = vmatprep.subr.bf16.mxu1 %v1892_v55 }
 0x1a6   : > { %1895 = vmatpush3.bf16.msra.mxu1 %v1892_v55 }
 0x1a7   : > { %1897 = vmatprep.subr.bf16.mxu1 %v1896_v58 }
 0x1aa   : > { %1899 = vmatpush3.bf16.msra.mxu1 %v1896_v58 }
 0x1ab   : > { %1901 = vmatprep.subr.bf16.mxu1 %v1900_v61 }
 0x1ae   : > { %1903 = vmatpush3.bf16.msra.mxu1 %v1900_v61 }
 0x1af   : > { %1905 = vmatprep.subr.bf16.mxu1 %v1904_v0 }
 0x1b2   : > { %1907 = vmatpush3.bf16.msra.mxu1 %v1904_v0 }
 0x1b3   : > { %1909 = vmatprep.subr.bf16.mxu1 %v1908_v3 }
 0x1b5   : > { %1740 = vmatmul.mubr.f32.vlgmr.msra.gmra.mrb[0].mxu1 %v691_v46 }
 0x1b6   : > { %1911 = vmatpush3.bf16.msra.mxu1 %v1908_v3  ;;  %1774 = vmatprep.mubr.f32.mxu1 %v697_v47 }
 0x1b7   : > { %1913 = vmatprep.subr.bf16.mxu1 %v1912_v7 }
 0x1ba   : > { %1915 = vmatpush3.bf16.msra.mxu1 %v1912_v7 }
 0x1bb   : > { %1917 = vmatprep.subr.bf16.mxu1 %v1916_v11 }
 0x1be   : > { %1919 = vmatpush3.bf16.msra.mxu1 %v1916_v11 }
 0x1bf   : > { %1921 = vmatprep.subr.bf16.mxu1 %v1920_v16 }
 0x1c2   : > { %1923 = vmatpush3.bf16.msra.mxu1 %v1920_v16 }
 0x1c3   : > { %1925 = vmatprep.subr.bf16.mxu1 %v1924_v19 }
 0x1c6   : > { %1927 = vmatpush3.bf16.msra.mxu1 %v1924_v19 }
 0x1c7   : > { %1929 = vmatprep.subr.bf16.mxu1 %v1928_v22 }
 0x1ca   : > { %1931 = vmatpush3.bf16.msra.mxu1 %v1928_v22 }
 0x1cb   : > { %1933 = vmatprep.subr.bf16.mxu1 %v1932_v24 }
 0x1ce   : > { %1935 = vmatpush3.bf16.msra.mxu1 %v1932_v24 }
 0x1cf   : > { %1937 = vmatprep.subr.bf16.mxu1 %v1936_v27 }
 0x1d2   : > { %1939 = vmatpush3.bf16.msra.mxu1 %v1936_v27 }
 0x1d5   : > { %1775 = vmatmul.mubr.msk.f32.vlgmr.msra.gmra.mrb[0].mxu1 %vm394_vm4, %v2614_v48 }
 0x2a8   : > { %v1776_v34 = vpop.f32.mrb[0].mxu1 }
 0x2a9   : > { %v986_v35 = vadd.f32 %v1776_v34, %v1500_v30  ;;  %v967_v36 = vpop.f32.mrb[1].mxu1 }
 0x2aa   : > { %v985_v37 = vadd.f32 %v1500_v30, %v967_v36 }
 0x2ab   : > { %vm988_vm7 = vcmp.gt.f32.partialorder %v986_v35, 0.0  ;;  %v990_v39 = vmul.f32 0.01, %v986_v35 }
 0x2ac   : > { %vm987_vm8 = vcmp.gt.f32.partialorder %v985_v37, 0.0  ;;  %v989_v41 = vmul.f32 0.01, %v985_v37 }
 0x2ad   : > { %v992_v14 = vsel %vm988_vm7, %v986_v35, %v990_v39 }
 0x2ae   : > { %v1084_v42 = vadd.f32 %v1080_v38, %v992_v14  ;;  %v991_v44 = vsel %vm987_vm8, %v985_v37, %v989_v41 }
 0x2af   : > { %v1083_v45 = vadd.f32 %v1075_v40, %v991_v44 }
 0x2b0   : > { %v1086_v46 = vmax.f32 %v1084_v42, 0.0 }
 0x2b1   : > { %v1085_v47 = vmax.f32 %v1083_v45, 0.0 }
 0x2b2   : > { %1088 = vst [vmem:[%s2632_s16 + $0x8] sm:$0xff] %v1086_v46  ;;  %v1108_v48 = vcombine.high %v1086_v46, %v1086_v46  ;;  %v1115_v49 = vrot.slane %v1086_v46, %v2628_v43 }
 0x2b3   : > { %1087 = vst [vmem:[%s2632_s16] sm:$0xff] %v1085_v47  ;;  %v1091_v50 = vcombine.high %v1085_v47, %v1085_v47  ;;  %v1098_v51 = vrot.slane %v1085_v47, %v2628_v43 }
 0x2b4   : > { %v1122_v52 = vrot.slane %v1108_v48, %v2628_v43  ;;  %v1123_v53 = vcombine.high %v1115_v49, %v1115_v49  ;;  %v1508_v58 = vrot.slane %v1115_v49, 9 }
 0x2b5   : > { %v1105_v54 = vrot.slane %v1091_v50, %v2628_v43  ;;  %v1106_v55 = vcombine.high %v1098_v51, %v1098_v51  ;;  %v1504_v56 = vrot.slane %v1098_v51, 9 }
 0x2b6   : > { %v1124_v59 = vcombine.high %v1122_v52, %v1122_v52  ;;  %v1509_v60 = vrot.slane %v1123_v53, 9  ;;  %v1510_v1 = vrot.slane %v1122_v52, 9  ;;  %v2649_v7 = vmax.f32 %v1115_v49, %v1508_v58 }
 0x2b7   : > { %v1107_v61 = vcombine.high %v1105_v54, %v1105_v54  ;;  %v1505_v62 = vrot.slane %v1106_v55, 9  ;;  %v1506_v63 = vrot.slane %v1105_v54, 9  ;;  %v2643_v0 = vmax.f32 %v1098_v51, %v1504_v56 }
 0x2b8   : > { %v1511_v6 = vrot.slane %v1124_v59, 9  ;;  %v2651_v9 = vmax.f32 %v1123_v53, %v1509_v60  ;;  %v2661_v15 = vmax.f32 %v1122_v52, %v1510_v1  ;;  %v1192_v19 = vrot.slane %v2649_v7, %v2641_v57 }
 0x2b9   : > { %v1507_v2 = vrot.slane %v1107_v61, 9  ;;  %v2645_v3 = vmax.f32 %v1106_v55, %v1505_v62  ;;  %v2647_v4 = vmax.f32 %v1105_v54, %v1506_v63  ;;  %v1176_v13 = vrot.slane %v2643_v0, %v2641_v57 }
 0x2ba   : > { %v2663_v16 = vmax.f32 %v1124_v59, %v1511_v6  ;;  %v1196_v21 = vrot.slane %v2651_v9, %v2641_v57  ;;  %v1200_v8 = vrot.slane %v2661_v15, %v2641_v57 }
 0x2bb   : > { %v1180_v10 = vrot.slane %v2645_v3, %v2641_v57  ;;  %v1184_v11 = vrot.slane %v2647_v4, %v2641_v57  ;;  %v2659_v12 = vmax.f32 %v1107_v61, %v1507_v2 }
 0x2bc   : > { %v1204_v24 = vrot.slane %v2663_v16, %v2641_v57 }
 0x2bd   : > { %v1188_v17 = vrot.slane %v2659_v12, %v2641_v57  ;;  %v1206_v18 = vsel %vm1205_vm9, %v1180_v10, %v1176_v13 }
 0x2be   : > { %v1208_v20 = vsel %vm1207_vm10, %v1184_v11, %v1206_v18 }
 0x2bf   : > { %v1210_v22 = vsel %vm1209_vm11, %v1188_v17, %v1208_v20 }
 0x2c0   : > { %v1212_v23 = vsel %vm1211_vm12, %v1192_v19, %v1210_v22 }
 0x2c1   : > { %v1214_v25 = vsel %vm1213_vm13, %v1196_v21, %v1212_v23 }
 0x2c2   : > { %v1216_v26 = vsel %vm1215_vm14, %v1200_v8, %v1214_v25 }
 0x2c3   : > { %v1218_v27 = vsel %vm1217_vm15, %v1204_v24, %v1216_v26 }
 0x2c4   : > { %1220 = vrot.lane.b32.xlu0 %v1218_v27, %s2281_s20 }
 0x2c5   : > { %2179 = shalt.err (!%p2176_p4)
}
 0x2c6   : > { %s2180_s17 = scalar_lea.hbm %s2689_s15, 256  ;;  %s2184_s25 = scalar_lea.hbm %s2796_s7, 512 }
 0x2c7   : > { %p2181_p9 = scmp.ne.s32.totalorder %s2689_s15, %s2180_s17  ;;  %p2185_p8 = scmp.lt.u32.totalorder %s2689_s15, %s2796_s7 }
 0x2c8   : > { %p2186_p13 = scmp.lt.u32.totalorder %s2184_s25, %s2180_s17  ;;  %p2188_p10 = scmp.lt.u32.totalorder %s2180_s17, %s2689_s15 }
 0x2c9   : > { %p2182_p0 = pnand %p2181_p9, %p2485_p5 }
 0x2ca   : > { %p2187_p6 = por %p2186_p13, %p2185_p8 }
 0x2cb   : > { %p2183_p11 = pneg %p2182_p0 }
 0x2cc   : > { %p2189_p3 = por %p2188_p10, %p2187_p6 }
 0x2ce   : > { %p2190_p7 = pnand %p2189_p3, %p2183_p11 }
 0x2d0   : > { %2193 = shalt.err (!%p2190_p7)
}
 0x2d1   : > { %s2283_s10 = smov 128   ;;  %s2284_s11 = smov 8  }
 0x2d2   : > { %1978 = dma.vmem_to_hbm [thread:$0]  (%p2485_p5), %s2681_s24, 256, %s2689_s15, %s1310_s27, %s2283_s10, %s2283_s10, %s2284_s11  }
 0x2d3   : > { %s1490_s13 = sshll.u32 %s2536_s12, 3  ;;  %s1516_s24 = sshll.u32 %s2352_s9, 7 }
 0x2d4   : > { %s378_s15 = scalar_lea.vmem [#allocation11], %s1490_s13  ;;  %s2744_s17 = scalar_lea.hbm %s2797_s8, %s1516_s24 }
 0x2d5   : > { %s1344_s27 = sshll.u32 %s378_s15, 4  ;;  %s1315_s9 = scalar_lea.sflag [#allocation12], %s2536_s12  ;;  %s2746_s27 = int_to_ptr.vmem [resolvable:$true] %s1344_s27 }
 0x2d6   : > { %s2194_s18 = scalar_lea.vmem %s2746_s27, 128  ;;  %s2285_s16 = smov [#allocation11]  }
 0x2d7   : > { %p2195_p12 = scmp.ne.s32.totalorder %s2746_s27, %s2194_s18  ;;  %s2198_s25 = sshll.u32 %s2285_s16, 4  ;;  %s2199_s25 = int_to_ptr.vmem [resolvable:$false] %s2198_s25 }
 0x2d8   : > { %s2200_s20 = scalar_lea.vmem %s2199_s25, 256  ;;  %p2201_p4 = scmp.lt.s32.totalorder %s2746_s27, %s2199_s25 }
 0x2d9   : > { %p2196_p1 = pnand %p2195_p12, %p2485_p5  ;;  %p2202_p9 = scmp.lt.s32.totalorder %s2200_s20, %s2194_s18 }
 0x2db   : > { %p2197_p2 = pneg %p2196_p1  ;;  %p2203_p0 = por %p2202_p9, %p2201_p4 }
 0x2dd   : > { %p2204_p11 = pnand %p2203_p0, %p2197_p2 }
 0x336   : > { %v1221_v28 = vpop.permute.xlu0 %1220 }
 0x337   : > { %v1223_v29 = vcombine.high %v1221_v28, %v1221_v28  ;;  %v1230_v30 = vrot.slane %v1221_v28, %v2628_v43 }
 0x339   : > { %v1237_v31 = vrot.slane %v1223_v29, %v2628_v43  ;;  %v1238_v32 = vcombine.high %v1230_v30, %v1230_v30  ;;  %v1240_v33 = vrot.slane %v1230_v30, 1  ;;  %v1252_v34 = vmax.f32 %v2643_v0, %v1230_v30 }
 0x33b   : > { %v1239_v35 = vcombine.high %v1237_v31, %v1237_v31  ;;  %v1241_v36 = vrot.slane %v1238_v32, 1  ;;  %v1242_v37 = vrot.slane %v1237_v31, 1  ;;  %v1253_v38 = vmax.f32 %v2645_v3, %v1240_v33 }
 0x33c   : > { %v1254_v5 = vmax.f32 %v2647_v4, %v1238_v32  ;;  %v1256_v41 = vmax.f32 %v2649_v7, %v1237_v31  ;;  %v1271_v42 = vrot.slane %v1252_v34, %v2641_v57 }
 0x33d   : > { %v1243_v39 = vrot.slane %v1239_v35, 1  ;;  %v1255_v40 = vmax.f32 %v2659_v12, %v1241_v36  ;;  %v1257_v14 = vmax.f32 %v2651_v9, %v1242_v37  ;;  %v1275_v43 = vrot.slane %v1253_v38, %v2641_v57 }
 0x33e   : > { %v1279_v44 = vrot.slane %v1254_v5, %v2641_v57  ;;  %v1258_v45 = vmax.f32 %v2661_v15, %v1239_v35  ;;  %v1287_v49 = vrot.slane %v1256_v41, %v2641_v57 }
 0x33f   : > { %v1283_v46 = vrot.slane %v1255_v40, %v2641_v57  ;;  %v1259_v47 = vmax.f32 %v2663_v16, %v1243_v39  ;;  %v1300_v48 = vsel %vm1205_vm9, %v1275_v43, %v1271_v42  ;;  %v1291_v51 = vrot.slane %v1257_v14, %v2641_v57 }
 0x340   : > { %v1301_v50 = vsel %vm1207_vm10, %v1279_v44, %v1300_v48  ;;  %v1295_v53 = vrot.slane %v1258_v45, %v2641_v57 }
 0x341   : > { %v1302_v52 = vsel %vm1209_vm11, %v1283_v46, %v1301_v50  ;;  %v1299_v55 = vrot.slane %v1259_v47, %v2641_v57 }
 0x342   : > { %v1303_v54 = vsel %vm1211_vm12, %v1287_v49, %v1302_v52 }
 0x343   : > { %v1304_v56 = vsel %vm1213_vm13, %v1291_v51, %v1303_v54 }
 0x344   : > { %v1305_v58 = vsel %vm1215_vm14, %v1295_v53, %v1304_v56 }
 0x345   : > { %v1306_v59 = vsel %vm1217_vm15, %v1299_v55, %v1305_v58 }
 0x346   : > { %1308 = vst [vmem:[%s378_s15] sm:$0xff] %v1306_v59 }
 0x347   : > { %2207 = shalt.err (!%p2204_p11)
}
 0x348   : > { %s2208_s12 = scalar_lea.hbm %s2744_s17, 128  ;;  %s2212_s11 = scalar_lea.hbm %s2797_s8, 256 }
 0x349   : > { %p2209_p8 = scmp.ne.s32.totalorder %s2744_s17, %s2208_s12  ;;  %p2213_p10 = scmp.lt.u32.totalorder %s2744_s17, %s2797_s8 }
 0x34a   : > { %p2214_p3 = scmp.lt.u32.totalorder %s2212_s11, %s2208_s12  ;;  %p2216_p12 = scmp.lt.u32.totalorder %s2208_s12, %s2744_s17 }
 0x34b   : > { %p2210_p13 = pnand %p2209_p8, %p2485_p5 }
 0x34c   : > { %p2215_p7 = por %p2214_p3, %p2213_p10 }
 0x34d   : > { %p2211_p6 = pneg %p2210_p13 }
 0x34e   : > { %p2217_p1 = por %p2216_p12, %p2215_p7 }
 0x350   : > { %p2218_p2 = pnand %p2217_p1, %p2211_p6 }
 0x352   : > { %2221 = shalt.err (!%p2218_p2)
}
 0x353   : > { %1979 = dma.vmem_to_hbm [thread:$0]  (%p2485_p5), %s2746_s27, 128, %s2744_s17, %s1315_s9  }
 0x354 PF: > { %s2819_s15 = sld [smem:[#allocation18_spill]]  ;;  %s2820_s19 = sld [smem:[#allocation19_spill]] }
 0x355   : > { %p2822_p9 = scmp.ge.s32.totalorder %s2272_s30, 2 }
 0x35a   : > { %s1356_s21 = sand.u32 1, %s2819_s15   ;;  %p2821_p4 = scmp.ne.s32.totalorder %s2820_s19, 0 }
 0x35b   : > { %s1357_s18 = scalar_lea.sflag [#allocation4], %s1356_s21 }
 0x35c   : > { %p1997_p0 = pnand %p2822_p9, %p2821_p4 }
 0x35e   : > { %2251 = dma.done.wait (!%p1997_p0), %s1357_s18, 256  }
 0x35f   : > { %2253 = vsyncadd (!%p1997_p0), %s1357_s18, 4294967040  ;;  %s1366_s16 = scalar_lea.sflag [#allocation12], %s1356_s21 }
 0x360   : > { %2255 = dma.done.wait (!%p1997_p0), %s1366_s16, 128  }
 0x361   : > { %2257 = vsyncadd (!%p1997_p0), %s1366_s16, 4294967168  ;;  %p27_p5 = scmp.ge.s32.totalorder %s2471_s26, 4   ;;  %s2823_s27 = smov %s2264_s28 }
 0x362   : > { %s2824_s28 = smov %s2268_s29  ;;  %s2825_s29 = smov %s2481_s22 }
 0x363   : > { %s2826_s30 = smov %s2471_s26  ;;  %29 = sbr.rel (!%p27_p5) target bundleno = 9 (0x9), region = 126 }
 0x36a   :  { %1371 = vsyncpa [#allocation3], 1 }
 0x36b   :  { %1373 = vsyncpa [#allocation3 + $0x1], 1 }
 0x36c   :  { %1374 = vsyncpa [#allocation6], 1 }
 0x36d   :  { %1375 = vsyncpa [#allocation9], 1 }
 0x36e   :  { %1376 = vsyncpa [#allocation4], 1 }
 0x36f   :  { %1378 = vsyncpa [#allocation4 + $0x1], 1 }
 0x370   :  { %1379 = vsyncpa [#allocation12], 1 }
 0x371   :  { %1381 = vsyncpa [#allocation12 + $0x1], 1 }

</bundles_post_ra>
